<compile_context>
chip_gen: v7x
topology: tpu7x:2x2x1
jax: 0.10.0
libtpu: 0.0.40
codegen_flags: <defaults>
</compile_context>

<pallas_src>
import jax
import jax.numpy as jnp
from jax.experimental import pallas as pl
from jax.experimental.pallas import tpu as pltpu

HIDDEN = 128                                # stand-in for hidden_layers=1000 (pad real 1000 -> 1024)
IN_DIM = 4 + 1 + 1 + 1 + 1                  # X_US.shape[1] + 4 = 8
OUT_DIM = 3 + 2 + 50 + 3 + 49 + 6 + 49      # X_CUR+X_WIN+X_ET+X_AC+X_T+X_AP+X_T = 162
OUT_PAD = 256                               # lane-dense padded output width (sliced back to 162)


# ------------------------------ kernel ---------------------------------------

def _lstm_zero_state_step(x, w_igo_bf16, b_igo):
    # PyTorch LSTMCell with zero (h, c), forget gate and W_hh pruned:
    #   gates = x @ W_ih[i|g|o].T + (b_ih + b_hh)[i|g|o]
    #   h' = sigmoid(o) * tanh(sigmoid(i) * tanh(g))
    # bf16 weight upcast to f32 once (weights are bf16 only for the DMA win);
    # all gate / nonlinearity math stays f32 (v5e has no bf16 VPU/EUP).
    gates = jnp.dot(x, w_igo_bf16[...].astype(jnp.float32),
                    preferred_element_type=jnp.float32) + b_igo
    i = jax.nn.sigmoid(gates[:, 0 * HIDDEN:1 * HIDDEN])
    g = jnp.tanh(gates[:, 1 * HIDDEN:2 * HIDDEN])
    o = jax.nn.sigmoid(gates[:, 2 * HIDDEN:3 * HIDDEN])
    return o * jnp.tanh(i * g)               # f32 activations, no bf16 round-trip


def multi_service_kernel(x_ref, w1_ref, b1_ref, w2_ref, b2_ref, wl_ref, bl_ref,
                         out_ref):
    h1 = _lstm_zero_state_step(x_ref[...], w1_ref, b1_ref[...])
    # forward calls lstm2 twice, each time with a fresh zero state
    h2 = _lstm_zero_state_step(h1, w2_ref, b2_ref[...])
    h2 = _lstm_zero_state_step(h2, w2_ref, b2_ref[...])
    out_ref[...] = (jnp.dot(h2, wl_ref[...].astype(jnp.float32),
                            preferred_element_type=jnp.float32)
                    + bl_ref[...])


@jax.jit
def multi_service_forward(y, kparams):
    # mirror the PyTorch `if len(y.shape) != 3: expand_dims(y, 0)` then use y[0]
    if y.ndim != 3:
        y = y[None, ...]
    x = y[0]                                  # (B, IN_DIM) f32 — cast lives in-kernel
    B = x.shape[0]
    w1, b1, w2, b2, wl, bl = kparams

    # No grid: single invocation, every operand pinned whole into VMEM
    # (total footprint ~200 KB at HIDDEN=128, ~8 MiB at the real HIDDEN~=1024,
    # which fits the default scoped limit on v5e/v6e/v7x — no vmem_limit_bytes).
    vmem_spec = pl.BlockSpec(memory_space=pltpu.MemorySpace.VMEM)
    out = pl.pallas_call(
        multi_service_kernel,
        out_shape=jax.ShapeDtypeStruct((B, OUT_PAD), jnp.float32),
        in_specs=[vmem_spec] * 7,
        out_specs=vmem_spec,
    )(x, w1, b1, w2, b2, wl, bl)
    # lane-dense kernel output; the slice fuses into the consumer under jit
    return out[:, :OUT_DIM]


# ------------------------- parameter preparation -----------------------------

def init_torch_style_params(key):
    # Deterministic U(-1/sqrt(H), 1/sqrt(H)) init in the PyTorch layout:
    #   LSTMCell: W_ih (4H, in), W_hh (4H, H), b_ih (4H,), b_hh (4H,)  [i,f,g,o]
    #   Linear:   W (OUT, H), b (OUT,)
    bound = 1.0 / (float(HIDDEN) ** 0.5)
    keys = jax.random.split(key, 10)

    def u(k, shape):
        return jax.random.uniform(k, shape, jnp.float32, -bound, bound)

    w1_ih = u(keys[0], (4 * HIDDEN, IN_DIM))
    w1_hh = u(keys[1], (4 * HIDDEN, HIDDEN))
    b1_ih = u(keys[2], (4 * HIDDEN,))
    b1_hh = u(keys[3], (4 * HIDDEN,))
    w2_ih = u(keys[4], (4 * HIDDEN, HIDDEN))
    w2_hh = u(keys[5], (4 * HIDDEN, HIDDEN))
    b2_ih = u(keys[6], (4 * HIDDEN,))
    b2_hh = u(keys[7], (4 * HIDDEN,))
    wl = u(keys[8], (OUT_DIM, HIDDEN))
    bl = u(keys[9], (OUT_DIM,))
    # lstm3 is never used by the original forward and is not materialized.
    return (w1_ih, w1_hh, b1_ih, b1_hh, w2_ih, w2_hh, b2_ih, b2_hh, wl, bl)


def _igo(a_4h):
    # drop the forget-gate block from a leading 4H axis -> [i | g | o] (3H)
    return jnp.concatenate(
        [a_4h[0 * HIDDEN:1 * HIDDEN],
         a_4h[2 * HIDDEN:3 * HIDDEN],
         a_4h[3 * HIDDEN:4 * HIDDEN]], axis=0)


def prepare_kernel_params(tparams):
    (w1_ih, _w1_hh, b1_ih, b1_hh,
     w2_ih, _w2_hh, b2_ih, b2_hh, wl, bl) = tparams

    def pack(w_ih, b_ih, b_hh):
        w = _igo(w_ih).T.astype(jnp.bfloat16)                       # (in, 3H) bf16 weights
        b = _igo(b_ih + b_hh)[None, :].astype(jnp.float32)          # (1, 3H) folded f32 bias
        return w, b

    w1, b1 = pack(w1_ih, b1_ih, b1_hh)
    w2, b2 = pack(w2_ih, b2_ih, b2_hh)
    wlp = jnp.zeros((HIDDEN, OUT_PAD), jnp.bfloat16).at[:, :OUT_DIM].set(
        wl.T.astype(jnp.bfloat16))
    blp = jnp.zeros((1, OUT_PAD), jnp.float32).at[:, :OUT_DIM].set(bl[None, :])
    return (w1, b1, w2, b2, wlp, blp)


# ------------------------------ reference ------------------------------------

def reference_forward(y, tparams):
    # Full PyTorch LSTMCell math (zero state, all four gates, W_hh included),
    # f32 throughout — the ground truth the pruned kernel must match.
    if y.ndim != 3:
        y = y[None, ...]
    x = y[0].astype(jnp.float32)
    (w1_ih, w1_hh, b1_ih, b1_hh,
     w2_ih, w2_hh, b2_ih, b2_hh, wl, bl) = tparams

    def cell(xx, w_ih, w_hh, b_ih, b_hh):
        h0 = jnp.zeros((xx.shape[0], HIDDEN), jnp.float32)
        c0 = jnp.zeros((xx.shape[0], HIDDEN), jnp.float32)
        gates = xx @ w_ih.T + b_ih + h0 @ w_hh.T + b_hh
        i, f, g, o = jnp.split(gates, 4, axis=1)
        c = jax.nn.sigmoid(f) * c0 + jax.nn.sigmoid(i) * jnp.tanh(g)
        return jax.nn.sigmoid(o) * jnp.tanh(c)

    h1 = cell(x, w1_ih, w1_hh, b1_ih, b1_hh)
    h2 = cell(h1, w2_ih, w2_hh, b2_ih, b2_hh)
    h2 = cell(h2, w2_ih, w2_hh, b2_ih, b2_hh)
    return h2 @ wl.T + bl


# ------------------------------- main ----------------------------------------

if __name__ == "__main__":
    key = jax.random.PRNGKey(0)
    kp, kx = jax.random.split(key)
    tparams = init_torch_style_params(kp)
    kparams = prepare_kernel_params(tparams)

    B = 8
    y = jax.random.normal(kx, (1, B, IN_DIM), jnp.float32)   # 3-D like the PyTorch path

    out = jax.block_until_ready(multi_service_forward(y, kparams))
    ref = reference_forward(y, tparams)

    assert out.shape == (B, OUT_DIM), out.shape
    # bf16 weights (f32 activations/accum) in the kernel vs f32 reference
    assert jnp.allclose(out, ref, atol=5e-2, rtol=5e-2), "mismatch vs JAX reference"
    print("KERNEL_OK")
</pallas_src>

<mosaic_0001>
module attributes {stable_mosaic.version = 11 : i64} {
  func.func @multi_service_kernel(%arg0: memref<8x8xf32, #tpu.memory_space<vmem>>, %arg1: memref<8x384xbf16, #tpu.memory_space<vmem>>, %arg2: memref<1x384xf32, #tpu.memory_space<vmem>>, %arg3: memref<128x384xbf16, #tpu.memory_space<vmem>>, %arg4: memref<1x384xf32, #tpu.memory_space<vmem>>, %arg5: memref<128x256xbf16, #tpu.memory_space<vmem>>, %arg6: memref<1x256xf32, #tpu.memory_space<vmem>>, %arg7: memref<8x256xf32, #tpu.memory_space<vmem>>) attributes {dimension_semantics = [], scalar_prefetch = 0 : i64, scratch_operands = 0 : i64, tpu.core_type = #tpu.core_type<tc>} {
    %c0 = arith.constant 0 : index
    %c0_0 = arith.constant 0 : index
    %0 = vector.load %arg0[%c0, %c0_0] : memref<8x8xf32, #tpu.memory_space<vmem>>, vector<8x8xf32>
    %c0_1 = arith.constant 0 : index
    %c0_2 = arith.constant 0 : index
    %1 = vector.load %arg2[%c0_1, %c0_2] : memref<1x384xf32, #tpu.memory_space<vmem>>, vector<1x384xf32>
    %c0_3 = arith.constant 0 : index
    %c0_4 = arith.constant 0 : index
    %2 = vector.load %arg1[%c0_3, %c0_4] : memref<8x384xbf16, #tpu.memory_space<vmem>>, vector<8x384xbf16>
    %3 = arith.extf %2 : vector<8x384xbf16> to vector<8x384xf32>
    %cst = arith.constant dense<0.000000e+00> : vector<8x384xf32>
    %4 = tpu.matmul %0, %3, %cst {dimension_numbers = #tpu.dot_dimension_numbers<[1], [0], [0], [1], [0, 0, 1, 1], [], []>} : vector<8x8xf32>, vector<8x384xf32>, vector<8x384xf32> -> vector<8x384xf32>
    %5 = vector.broadcast %1 : vector<1x384xf32> to vector<8x384xf32>
    %6 = arith.addf %4, %5 : vector<8x384xf32>
    %7 = vector.extract_strided_slice %6 {offsets = [0, 0], sizes = [8, 128], strides = [1, 1]} : vector<8x384xf32> to vector<8x128xf32>
    %8 = arith.negf %7 : vector<8x128xf32>
    %9 = math.exp %8 : vector<8x128xf32>
    %cst_5 = arith.constant 1.000000e+00 : f32
    %10 = vector.broadcast %cst_5 : f32 to vector<8x128xf32>
    %11 = arith.addf %10, %9 : vector<8x128xf32>
    %12 = arith.divf %10, %11 : vector<8x128xf32>
    %13 = vector.extract_strided_slice %6 {offsets = [0, 128], sizes = [8, 128], strides = [1, 1]} : vector<8x384xf32> to vector<8x128xf32>
    %14 = math.tanh %13 : vector<8x128xf32>
    %15 = vector.extract_strided_slice %6 {offsets = [0, 256], sizes = [8, 128], strides = [1, 1]} : vector<8x384xf32> to vector<8x128xf32>
    %16 = arith.negf %15 : vector<8x128xf32>
    %17 = math.exp %16 : vector<8x128xf32>
    %cst_6 = arith.constant 1.000000e+00 : f32
    %18 = vector.broadcast %cst_6 : f32 to vector<8x128xf32>
    %19 = arith.addf %18, %17 : vector<8x128xf32>
    %20 = arith.divf %18, %19 : vector<8x128xf32>
    %21 = arith.mulf %12, %14 : vector<8x128xf32>
    %22 = math.tanh %21 : vector<8x128xf32>
    %23 = arith.mulf %20, %22 : vector<8x128xf32>
    %c0_7 = arith.constant 0 : index
    %c0_8 = arith.constant 0 : index
    %24 = vector.load %arg4[%c0_7, %c0_8] : memref<1x384xf32, #tpu.memory_space<vmem>>, vector<1x384xf32>
    %c0_9 = arith.constant 0 : index
    %c0_10 = arith.constant 0 : index
    %25 = vector.load %arg3[%c0_9, %c0_10] : memref<128x384xbf16, #tpu.memory_space<vmem>>, vector<128x384xbf16>
    %26 = arith.extf %25 : vector<128x384xbf16> to vector<128x384xf32>
    %cst_11 = arith.constant dense<0.000000e+00> : vector<8x384xf32>
    %27 = tpu.matmul %23, %26, %cst_11 {dimension_numbers = #tpu.dot_dimension_numbers<[1], [0], [0], [1], [0, 0, 1, 1], [], []>} : vector<8x128xf32>, vector<128x384xf32>, vector<8x384xf32> -> vector<8x384xf32>
    %28 = vector.broadcast %24 : vector<1x384xf32> to vector<8x384xf32>
    %29 = arith.addf %27, %28 : vector<8x384xf32>
    %30 = vector.extract_strided_slice %29 {offsets = [0, 0], sizes = [8, 128], strides = [1, 1]} : vector<8x384xf32> to vector<8x128xf32>
    %31 = arith.negf %30 : vector<8x128xf32>
    %32 = math.exp %31 : vector<8x128xf32>
    %cst_12 = arith.constant 1.000000e+00 : f32
    %33 = vector.broadcast %cst_12 : f32 to vector<8x128xf32>
    %34 = arith.addf %33, %32 : vector<8x128xf32>
    %35 = arith.divf %33, %34 : vector<8x128xf32>
    %36 = vector.extract_strided_slice %29 {offsets = [0, 128], sizes = [8, 128], strides = [1, 1]} : vector<8x384xf32> to vector<8x128xf32>
    %37 = math.tanh %36 : vector<8x128xf32>
    %38 = vector.extract_strided_slice %29 {offsets = [0, 256], sizes = [8, 128], strides = [1, 1]} : vector<8x384xf32> to vector<8x128xf32>
    %39 = arith.negf %38 : vector<8x128xf32>
    %40 = math.exp %39 : vector<8x128xf32>
    %cst_13 = arith.constant 1.000000e+00 : f32
    %41 = vector.broadcast %cst_13 : f32 to vector<8x128xf32>
    %42 = arith.addf %41, %40 : vector<8x128xf32>
    %43 = arith.divf %41, %42 : vector<8x128xf32>
    %44 = arith.mulf %35, %37 : vector<8x128xf32>
    %45 = math.tanh %44 : vector<8x128xf32>
    %46 = arith.mulf %43, %45 : vector<8x128xf32>
    %c0_14 = arith.constant 0 : index
    %c0_15 = arith.constant 0 : index
    %47 = vector.load %arg4[%c0_14, %c0_15] : memref<1x384xf32, #tpu.memory_space<vmem>>, vector<1x384xf32>
    %c0_16 = arith.constant 0 : index
    %c0_17 = arith.constant 0 : index
    %48 = vector.load %arg3[%c0_16, %c0_17] : memref<128x384xbf16, #tpu.memory_space<vmem>>, vector<128x384xbf16>
    %49 = arith.extf %48 : vector<128x384xbf16> to vector<128x384xf32>
    %cst_18 = arith.constant dense<0.000000e+00> : vector<8x384xf32>
    %50 = tpu.matmul %46, %49, %cst_18 {dimension_numbers = #tpu.dot_dimension_numbers<[1], [0], [0], [1], [0, 0, 1, 1], [], []>} : vector<8x128xf32>, vector<128x384xf32>, vector<8x384xf32> -> vector<8x384xf32>
    %51 = vector.broadcast %47 : vector<1x384xf32> to vector<8x384xf32>
    %52 = arith.addf %50, %51 : vector<8x384xf32>
    %53 = vector.extract_strided_slice %52 {offsets = [0, 0], sizes = [8, 128], strides = [1, 1]} : vector<8x384xf32> to vector<8x128xf32>
    %54 = arith.negf %53 : vector<8x128xf32>
    %55 = math.exp %54 : vector<8x128xf32>
    %cst_19 = arith.constant 1.000000e+00 : f32
    %56 = vector.broadcast %cst_19 : f32 to vector<8x128xf32>
    %57 = arith.addf %56, %55 : vector<8x128xf32>
    %58 = arith.divf %56, %57 : vector<8x128xf32>
    %59 = vector.extract_strided_slice %52 {offsets = [0, 128], sizes = [8, 128], strides = [1, 1]} : vector<8x384xf32> to vector<8x128xf32>
    %60 = math.tanh %59 : vector<8x128xf32>
    %61 = vector.extract_strided_slice %52 {offsets = [0, 256], sizes = [8, 128], strides = [1, 1]} : vector<8x384xf32> to vector<8x128xf32>
    %62 = arith.negf %61 : vector<8x128xf32>
    %63 = math.exp %62 : vector<8x128xf32>
    %cst_20 = arith.constant 1.000000e+00 : f32
    %64 = vector.broadcast %cst_20 : f32 to vector<8x128xf32>
    %65 = arith.addf %64, %63 : vector<8x128xf32>
    %66 = arith.divf %64, %65 : vector<8x128xf32>
    %67 = arith.mulf %58, %60 : vector<8x128xf32>
    %68 = math.tanh %67 : vector<8x128xf32>
    %69 = arith.mulf %66, %68 : vector<8x128xf32>
    %c0_21 = arith.constant 0 : index
    %c0_22 = arith.constant 0 : index
    %70 = vector.load %arg5[%c0_21, %c0_22] : memref<128x256xbf16, #tpu.memory_space<vmem>>, vector<128x256xbf16>
    %71 = arith.extf %70 : vector<128x256xbf16> to vector<128x256xf32>
    %cst_23 = arith.constant dense<0.000000e+00> : vector<8x256xf32>
    %72 = tpu.matmul %69, %71, %cst_23 {dimension_numbers = #tpu.dot_dimension_numbers<[1], [0], [0], [1], [0, 0, 1, 1], [], []>} : vector<8x128xf32>, vector<128x256xf32>, vector<8x256xf32> -> vector<8x256xf32>
    %c0_24 = arith.constant 0 : index
    %c0_25 = arith.constant 0 : index
    %73 = vector.load %arg6[%c0_24, %c0_25] : memref<1x256xf32, #tpu.memory_space<vmem>>, vector<1x256xf32>
    %74 = vector.broadcast %73 : vector<1x256xf32> to vector<8x256xf32>
    %75 = arith.addf %72, %74 : vector<8x256xf32>
    %c0_26 = arith.constant 0 : index
    %c0_27 = arith.constant 0 : index
    %76 = vector.load %arg7[%c0_26, %c0_27] : memref<8x256xf32, #tpu.memory_space<vmem>>, vector<8x256xf32>
    tpu.vector_store %arg7[%c0_26, %c0_27], %75 {strides = array<i32>} : memref<8x256xf32, #tpu.memory_space<vmem>>, vector<8x256xf32>,
    return
  }
}

</mosaic_0001>

<bundles_post_ra>
// kernel: multi_service_forward.1
= control target key start
LH: loop header
LB: loop body
LE: loop exit
PB: predicated region body
PF: predicated region fallthrough
CT: control target
= control target key end

     0   :  { %12 = vsyncpa [#allocation3], 0  ;;  %s1639_s0 = inlined_call_operand.hbm [shape: f32[8,8], index: 0, kind: input, shape index: {}]   ;;  %s1640_s1 = inlined_call_operand.hbm [shape: bf16[8,384], index: 1, kind: input, shape index: {}]   ;;  %s1641_s2 = inlined_call_operand.vmem [shape: f32[1,384], index: 2, kind: input, shape index: {}]   ;;  %s1642_s3 = inlined_call_operand.hbm [shape: bf16[128,384], index: 3, kind: input, shape index: {}]   ;;  %s1643_s4 = inlined_call_operand.vmem [shape: f32[1,384], index: 4, kind: input, shape index: {}]   ;;  %s1644_s5 = inlined_call_operand.hbm [shape: bf16[128,256], index: 5, kind: input, shape index: {}]   ;;  %s1645_s6 = inlined_call_operand.vmem [shape: f32[1,256], index: 6, kind: input, shape index: {}]   ;;  %s1646_s7 = inlined_call_operand.hbm [shape: f32[8,256], index: 7, kind: output, shape index: {}]  }
   0x1   :  { %13 = vsyncpa [#allocation6], 0 }
   0x2   :  { %14 = vsyncpa [#allocation9], 0 }
   0x3   :  { %15 = vsyncpa [#allocation4], 0  ;;  %s1372_s24 = smov [#allocation5]   ;;  %s1373_s26 = smov [#allocation2]  }
   0x4   :  { %s32_s25 = sshll.u32 %s1372_s24, 4  ;;  %s22_s27 = sshll.u32 %s1373_s26, 4  ;;  %s33_s25 = int_to_ptr.vmem [resolvable:$true] %s32_s25  ;;  %s23_s27 = int_to_ptr.vmem [resolvable:$true] %s22_s27 }
   0x5   :  { %s1254_s30 = scalar_lea.hbm %s1640_s1, 192 }
   0x6   :  { %p1255_p0 = scmp.ne.s32.totalorder %s1640_s1, %s1254_s30  ;;  %p1258_p1 = scmp.lt.u32.totalorder %s1254_s30, %s1640_s1 }
   0x8   :  { %p1260_p2 = pnand %p1258_p1, %p1255_p0 }
   0xa   :  { %1263 = shalt.err (!%p1260_p2)
}
   0xb   :  { %s1264_s12 = scalar_lea.vmem %s33_s25, 192  ;;  %p1269_p4 = scmp.lt.s32.totalorder %s33_s25, %s33_s25 }
   0xc   :  { %p1265_p3 = scmp.ne.s32.totalorder %s33_s25, %s1264_s12  ;;  %p1270_p5 = scmp.lt.s32.totalorder %s1264_s12, %s1264_s12 }
   0xe   :  { %p1271_p6 = por %p1270_p5, %p1269_p4 }
  0x10   :  { %p1272_p7 = pnand %p1271_p6, %p1265_p3 }
  0x12   :  { %1275 = shalt.err (!%p1272_p7)
}
  0x13   :  { %35 = dma.hbm_to_vmem [thread:$0]  %s1640_s1, 192, %s33_s25, [#allocation6]  }
  0x14   :  { %s1276_s17 = scalar_lea.hbm %s1639_s0, 128 }
  0x15   :  { %p1277_p8 = scmp.ne.s32.totalorder %s1639_s0, %s1276_s17  ;;  %p1280_p9 = scmp.lt.u32.totalorder %s1276_s17, %s1639_s0 }
  0x17   :  { %p1282_p10 = pnand %p1280_p9, %p1277_p8 }
  0x19   :  { %1285 = shalt.err (!%p1282_p10)
}
  0x1a   :  { %s1286_s22 = scalar_lea.vmem %s23_s27, 128  ;;  %p1291_p12 = scmp.lt.s32.totalorder %s23_s27, %s23_s27 }
  0x1b   :  { %p1287_p11 = scmp.ne.s32.totalorder %s23_s27, %s1286_s22  ;;  %p1292_p13 = scmp.lt.s32.totalorder %s1286_s22, %s1286_s22 }
  0x1d   :  { %p1293_p0 = por %p1292_p13, %p1291_p12 }
  0x1f   :  { %p1294_p1 = pnand %p1293_p0, %p1287_p11 }
  0x21   :  { %1297 = shalt.err (!%p1294_p1)
}
  0x22   :  { %25 = dma.hbm_to_vmem [thread:$0]  %s1639_s0, 128, %s23_s27, [#allocation3]  }
  0x23   :  { %s1374_s24 = smov [#allocation7]   ;;  %s1298_s29 = scalar_lea.hbm %s1642_s3, 3072 }
  0x24   :  { %s43_s25 = sshll.u32 %s1374_s24, 4  ;;  %p1299_p2 = scmp.ne.s32.totalorder %s1642_s3, %s1298_s29  ;;  %s44_s25 = int_to_ptr.vmem [resolvable:$true] %s43_s25 }
  0x25   :  { %p1302_p3 = scmp.lt.u32.totalorder %s1298_s29, %s1642_s3 }
  0x27   :  { %p1304_p4 = pnand %p1302_p3, %p1299_p2 }
  0x29   :  { %1307 = shalt.err (!%p1304_p4)
}
  0x2a   :  { %s1308_s11 = scalar_lea.vmem %s44_s25, 3072  ;;  %p1313_p6 = scmp.lt.s32.totalorder %s44_s25, %s44_s25 }
  0x2b   :  { %p1309_p5 = scmp.ne.s32.totalorder %s44_s25, %s1308_s11  ;;  %p1314_p7 = scmp.lt.s32.totalorder %s1308_s11, %s1308_s11 }
  0x2d   :  { %p1315_p8 = por %p1314_p7, %p1313_p6 }
  0x2f   :  { %p1316_p9 = pnand %p1315_p8, %p1309_p5 }
  0x31   :  { %1319 = shalt.err (!%p1316_p9)
}
  0x32   :  { %s1375_s0 = smov 192   ;;  %s1376_s27 = smov 12  }
  0x33   :  { %49 = dma.hbm_to_vmem [thread:$0]  %s1642_s3, 3072, %s44_s25, [#allocation6], %s1375_s0, %s1375_s0, %s1376_s27  }
  0x34   :  { %s1377_s14 = smov [#allocation8]   ;;  %s1320_s18 = scalar_lea.hbm %s1644_s5, 2048 }
  0x35   :  { %s57_s15 = sshll.u32 %s1377_s14, 4  ;;  %p1321_p10 = scmp.ne.s32.totalorder %s1644_s5, %s1320_s18  ;;  %s58_s15 = int_to_ptr.vmem [resolvable:$true] %s57_s15 }
  0x36   :  { %p1324_p11 = scmp.lt.u32.totalorder %s1320_s18, %s1644_s5 }
  0x38   :  { %p1326_p12 = pnand %p1324_p11, %p1321_p10 }
  0x3a   :  { %1329 = shalt.err (!%p1326_p12)
}
  0x3b   :  { %s1330_s1 = scalar_lea.vmem %s58_s15, 2048  ;;  %p1335_p0 = scmp.lt.s32.totalorder %s58_s15, %s58_s15 }
  0x3c   :  { %p1331_p13 = scmp.ne.s32.totalorder %s58_s15, %s1330_s1  ;;  %p1336_p1 = scmp.lt.s32.totalorder %s1330_s1, %s1330_s1 }
  0x3e   :  { %p1337_p2 = por %p1336_p1, %p1335_p0 }
  0x40   :  { %p1338_p3 = pnand %p1337_p2, %p1331_p13 }
  0x42   :  { %1341 = shalt.err (!%p1338_p3)
}
  0x43   :  { %s1378_s3 = smov 128   ;;  %s1379_s23 = smov 8  }
  0x44   :  { %63 = dma.hbm_to_vmem [thread:$0]  %s1644_s5, 2048, %s58_s15, [#allocation9], %s1378_s3, %s1378_s3, %s1379_s23  }
  0x45   :  { %1364 = dma.done.wait [#allocation3], 128  }
  0x46   :  { %1365 = vsyncadd [#allocation3], 4294967168 }
  0x47   :  { %1366 = dma.done.wait [#allocation6], 3264  }
  0x48   :  { %1367 = vsyncadd [#allocation6], 4294964032 }
  0x49   :  { %1368 = dma.done.wait [#allocation9], 2048  }
  0x4a   :  { %1369 = vsyncadd [#allocation9], 4294965248  ;;  %v1380_v0 = vmov 0.0   ;;  %v80_v1 = vld [vmem:[#allocation5] sm:$0xff]  ;;  %v81_v2 = vld [vmem:[#allocation5 + $0x8] sm:$0xf]  ;;  %v86_v32 = vlaneseq }
  0x4b   :  { %169 = vmatprep.mubr.f32.mxu1 %v1380_v0  ;;  %423 = vmatprep.mubr.f32.mxu0 %v1380_v0  ;;  %v83_v3 = vunpack.c.h.bf16 %v80_v1  ;;  %v82_v4 = vunpack.c.l.bf16 %v80_v1  ;;  %v78_v5 = vld [vmem:[#allocation2] sm:$0xff]  ;;  %vm101_vm0 = vcmask 64512   ;;  %v84_v6 = vunpack.c.l.bf16 %v81_v2  ;;  %v1481_v9 = vld [vmem:[#allocation7 + $0x8] ss:$12 sps:$4 sm:$0xff]   ;;  %v1489_v12 = vld [vmem:[#allocation7 + $0x18] ss:$12 sps:$4 sm:$0xff]  }
  0x4c   :  { %vm1381_vm1 = vmmov 0   ;;  %v1162_v7 = vld [vmem:[#allocation7 + $0x4] ss:$12 sps:$4 sm:$0xff]   ;;  %v1479_v8 = vld [vmem:[#allocation7] ss:$12 sps:$4 sm:$0xff]   ;;  %v1382_v10 = vmov 0.0|0.0  }
  0x4d   :  { %105 = vmatprep.subr.mxu1 %v83_v3  ;;  %943 = vmatprep.subr.bf16.mxu0 %v1162_v7  ;;  %v1486_v11 = vld [vmem:[#allocation7 + $0x1c] ss:$12 sps:$4 sm:$0xff]   ;;  %v1491_v13 = vld [vmem:[#allocation7 + $0x20] ss:$12 sps:$4 sm:$0xff]   ;;  %v1501_v16 = vld [vmem:[#allocation7 + $0x38] ss:$12 sps:$4 sm:$0xff]  }
  0x4e   :  { %106 = vmatpush1.msra.mxu1 %v82_v4  ;;  %945 = vmatpush1.bf16.msra.mxu0 %v1479_v8  ;;  %v1496_v14 = vld [vmem:[#allocation7 + $0x34] ss:$12 sps:$4 sm:$0xff]   ;;  %v1499_v15 = vld [vmem:[#allocation7 + $0x30] ss:$12 sps:$4 sm:$0xff]   ;;  %v1506_v17 = vld [vmem:[#allocation7 + $0x4c] ss:$12 sps:$4 sm:$0xff]  }
  0x4f   :  { %823 = vmatmul.mubr.msk.f32.vlgmr.msra.gmra.mrb[0].mxu1 %vm101_vm0, %v78_v5  ;;  %867 = vmatprep.subr.mxu1 %v1380_v0  ;;  %v1509_v18 = vld [vmem:[#allocation7 + $0x48] ss:$12 sps:$4 sm:$0xff]   ;;  %v1511_v19 = vld [vmem:[#allocation7 + $0x50] ss:$12 sps:$4 sm:$0xff]   ;;  %v1519_v21 = vld [vmem:[#allocation7 + $0x60] ss:$12 sps:$4 sm:$0xff]  }
  0x50   :  { %868 = vmatpush3.msra.mxu1 %v84_v6  ;;  %869 = vmatprep.mubr.msk.f32.mxu1 %vm1381_vm1, %v1380_v0  ;;  %v1516_v20 = vld [vmem:[#allocation7 + $0x64] ss:$12 sps:$4 sm:$0xff]   ;;  %v1521_v22 = vld [vmem:[#allocation7 + $0x68] ss:$12 sps:$4 sm:$0xff]   ;;  %v1531_v25 = vld [vmem:[#allocation7 + $0x80] ss:$12 sps:$4 sm:$0xff]  }
  0x51   :  { %974 = vmatprep.subr.bf16.mxu1 %v1382_v10  ;;  %947 = vmatprep.subr.bf16.mxu0 %v1486_v11  ;;  %v1526_v23 = vld [vmem:[#allocation7 + $0x7c] ss:$12 sps:$4 sm:$0xff]   ;;  %v1529_v24 = vld [vmem:[#allocation7 + $0x78] ss:$12 sps:$4 sm:$0xff]   ;;  %v1533_v26 = vld [vmem:[#allocation7 + $0x94] ss:$12 sps:$4 sm:$0xff]  }
  0x52   :  { %949 = vmatpush1.bf16.msra.mxu0 %v1489_v12  ;;  %v1538_v27 = vld [vmem:[#allocation7 + $0x90] ss:$12 sps:$4 sm:$0xff]   ;;  %v1540_v28 = vld [vmem:[#allocation7 + $0x98] ss:$12 sps:$4 sm:$0xff]   ;;  %v1548_v30 = vld [vmem:[#allocation7 + $0xa8] ss:$12 sps:$4 sm:$0xff]  }
  0x53   :  { %870 = vmatmul.mubr.msk.f32.vlgmr.msra.gmra.mrb[2].mxu1 %vm101_vm0, %v78_v5  ;;  %951 = vmatprep.subr.bf16.mxu0 %v1496_v14  ;;  %v1544_v29 = vld [vmem:[#allocation7 + $0xac] ss:$12 sps:$4 sm:$0xff]   ;;  %v1550_v31 = vld [vmem:[#allocation7 + $0xb0] ss:$12 sps:$4 sm:$0xff]   ;;  %v1557_v33 = vshrl.u32 %v86_v32, 7  ;;  %s1383_s30 = smov [#allocation10]  }
  0x54   :  { %904 = vmatprep.mubr.msk.f32.mxu1 %vm1381_vm1, %v1380_v0  ;;  %976 = vmatpush3.bf16.msra.mxu1 %v1481_v9  ;;  %v79_v35 = vld [vmem:[%s1641_s2] sm:$0x7]  ;;  %v1214_v32 = vld [vmem:[#allocation8 + $0x60] ss:$8 sps:$4 sm:$0xff]   ;;  %s812_s8 = sshll.u32 %s1383_s30, 4  ;;  %s813_s8 = int_to_ptr.vmem [resolvable:$true] %s812_s8 }
  0x55   :  { %977 = vmatprep.subr.bf16.mxu1 %v1382_v10  ;;  %v1560_v34 = vsub.s32 0, %v1557_v33  ;;  %v96_v37 = vsub.s32 2, %v1557_v33  ;;  %v1570_v44 = vsub.s32 1, %v1557_v33  ;;  %v262_v60 = vld [vmem:[%s1643_s4] sm:$0x7]  ;;  %s1342_s9 = scalar_lea.vmem %s813_s8, 256  ;;  %p1347_p5 = scmp.lt.s32.totalorder %s813_s8, %s813_s8 }
  0x56   :  { %953 = vmatpush1.bf16.msra.mxu0 %v1499_v15  ;;  %v1215_v33 = vld [vmem:[#allocation8 + $0x74] ss:$8 sps:$4 sm:$0xff]   ;;  %p1343_p4 = scmp.ne.s32.totalorder %s813_s8, %s1342_s9  ;;  %p1348_p6 = scmp.lt.s32.totalorder %s1342_s9, %s1342_s9 }
  0x57   :  { %955 = vmatprep.subr.bf16.mxu0 %v1506_v17  ;;  %v89_v36 = vrot.slane %v79_v35, %v1560_v34  ;;  %v97_v41 = vrot.slane %v79_v35, %v96_v37  ;;  %v93_v48 = vrot.slane %v79_v35, %v1570_v44  ;;  %v1610_v61 = vrot.slane %v262_v60, %v1560_v34  ;;  %v1217_v35 = vld [vmem:[#allocation8 + $0x70] ss:$8 sps:$4 sm:$0xff]  }
  0x58   :  { %979 = vmatpush3.bf16.msra.mxu1 %v1491_v13  ;;  %v1615_v2 = vrot.slane %v262_v60, %v96_v37  ;;  %p1349_p7 = por %p1348_p6, %p1347_p5 }
  0x59   :  { %980 = vmatprep.subr.bf16.mxu1 %v1382_v10 }
  0x5a   :  { %957 = vmatpush1.bf16.msra.mxu0 %v1509_v18  ;;  %p1350_p8 = pnand %p1349_p7, %p1343_p4 }
  0x5b   :  { %959 = vmatprep.subr.bf16.mxu0 %v1516_v20 }
  0x5c   :  { %982 = vmatpush3.bf16.msra.mxu1 %v1501_v16 }
  0x5d   :  { %983 = vmatprep.subr.bf16.mxu1 %v1382_v10 }
  0x5e   :  { %961 = vmatpush1.bf16.msra.mxu0 %v1519_v21 }
  0x5f   :  { %963 = vmatprep.subr.bf16.mxu0 %v1526_v23 }
  0x60   :  { %985 = vmatpush3.bf16.msra.mxu1 %v1511_v19 }
  0x61   :  { %986 = vmatprep.subr.bf16.mxu1 %v1382_v10 }
  0x62   :  { %965 = vmatpush1.bf16.msra.mxu0 %v1529_v24 }
  0x63   :  { %967 = vmatprep.subr.bf16.mxu0 %v1533_v26 }
  0x64   :  { %988 = vmatpush3.bf16.msra.mxu1 %v1521_v22 }
  0x65   :  { %989 = vmatprep.subr.bf16.mxu1 %v1382_v10 }
  0x66   :  { %969 = vmatpush1.bf16.msra.mxu0 %v1538_v27 }
  0x67   :  { %971 = vmatprep.subr.bf16.mxu0 %v1544_v29 }
  0x68   :  { %991 = vmatpush3.bf16.msra.mxu1 %v1531_v25 }
  0x69   :  { %992 = vmatprep.subr.bf16.mxu1 %v1382_v10 }
  0x6a   :  { %973 = vmatpush1.bf16.msra.mxu0 %v1548_v30 }
  0x6b   :  { %999 = vmatprep.subr.bf16.mxu0 %v1162_v7 }
  0x6c   :  { %994 = vmatpush3.bf16.msra.mxu1 %v1540_v28 }
  0x6d   :  { %995 = vmatprep.subr.bf16.mxu1 %v1382_v10 }
  0x70   :  { %997 = vmatpush3.bf16.msra.mxu1 %v1550_v31 }
  0x71   :  { %1030 = vmatprep.subr.bf16.mxu1 %v1382_v10 }
 0x122   :  { %v171_v38 = vpop.f32.mrb[0].mxu1 }
 0x123   :  { %v172_v39 = vadd.f32 %v171_v38, %v89_v36  ;;  %v173_v40 = vpop.f32.mrb[1].mxu1 }
 0x124   :  { %v174_v49 = vadd.f32 %v173_v40, %v93_v48 }
 0x125   :  { %v825_v42 = vmul.f32 -1.442695, %v172_v39 }
 0x126   :  { %v242_v43 = vpop.f32.mrb[2].mxu1 }
 0x127   :  { %1218 = vpow2.f32 %v825_v42  ;;  %v243_v45 = vadd.f32 %v242_v43, %v97_v41  ;;  %v871_v46 = vpop.f32.mrb[3].mxu1 }
 0x129   :  { %v826_v47 = vmul.f32 -1.442695, %v243_v45 }
 0x12b   :  { %1220 = vpow2.f32 %v826_v47 }
 0x12c   :  { %1222 = vtanh.f32 %v174_v49 }
 0x131   :  { %v1219_v50 = vpop.eup %1218 }
 0x132   :  { %v249_v51 = vadd.f32 1.0, %v1219_v50 }
 0x134   :  { %1224 = vrcp.f32 %v249_v51 }
 0x135   :  { %v1221_v52 = vpop.eup %1220 }
 0x136   :  { %v256_v53 = vadd.f32 1.0, %v1221_v52  ;;  %v1223_v54 = vpop.eup %1222 }
 0x138   :  { %1226 = vrcp.f32 %v256_v53 }
 0x13e   :  { %v1225_v55 = vpop.eup %1224 }
 0x13f   :  { %v259_v56 = vmul.f32 %v1225_v55, %v1223_v54 }
 0x141   :  { %1228 = vtanh.f32 %v259_v56  ;;  %v721_v56 = vld [vmem:[%s1645_s6] sm:$0x3] }
 0x142   :  { %v1227_v57 = vpop.eup %1226 }
 0x14b   :  { %v1229_v58 = vpop.eup %1228 }
 0x14c   :  { %v261_v59 = vmul.f32 %v1229_v58, %v1227_v57  ;;  %v726_v57 = vrot.slane %v721_v56, %v1560_v34  ;;  %v730_v58 = vrot.slane %v721_v56, %v1570_v44 }
 0x14e   :  { %424 = vmatmul.mubr.f32.vlgmr.msra.gmra.mrb[0].mxu0 %v261_v59  ;;  %905 = vmatmul.mubr.f32.vlgmr.msra.gmra.mrb[4].mxu1 %v261_v59 }
 0x14f   :  { %1001 = vmatpush1.bf16.msra.mxu0 %v1479_v8  ;;  %1032 = vmatpush3.bf16.msra.mxu1 %v1481_v9  ;;  %v351_v8 = vrot.slane %v262_v60, %v1570_v44 }
 0x150   :  { %1003 = vmatprep.subr.bf16.mxu0 %v1486_v11  ;;  %1033 = vmatprep.subr.bf16.mxu1 %v1382_v10 }
 0x151   :  { %580 = vmatprep.mubr.f32.mxu0 %v1380_v0  ;;  %939 = vmatprep.mubr.msk.f32.mxu1 %vm1381_vm1, %v1380_v0 }
 0x153   :  { %1005 = vmatpush1.bf16.msra.mxu0 %v1489_v12  ;;  %1035 = vmatpush3.bf16.msra.mxu1 %v1491_v13 }
 0x154   :  { %1007 = vmatprep.subr.bf16.mxu0 %v1496_v14  ;;  %1036 = vmatprep.subr.bf16.mxu1 %v1382_v10 }
 0x157   :  { %1009 = vmatpush1.bf16.msra.mxu0 %v1499_v15  ;;  %1038 = vmatpush3.bf16.msra.mxu1 %v1501_v16 }
 0x158   :  { %1011 = vmatprep.subr.bf16.mxu0 %v1506_v17  ;;  %1039 = vmatprep.subr.bf16.mxu1 %v1382_v10 }
 0x15b   :  { %1013 = vmatpush1.bf16.msra.mxu0 %v1509_v18  ;;  %1041 = vmatpush3.bf16.msra.mxu1 %v1511_v19 }
 0x15c   :  { %1015 = vmatprep.subr.bf16.mxu0 %v1516_v20  ;;  %1042 = vmatprep.subr.bf16.mxu1 %v1382_v10  ;;  %v1194_v20 = vld [vmem:[#allocation8 + $0x4] ss:$8 sps:$4 sm:$0xff]  }
 0x15f   :  { %1017 = vmatpush1.bf16.msra.mxu0 %v1519_v21  ;;  %1044 = vmatpush3.bf16.msra.mxu1 %v1521_v22  ;;  %v1196_v21 = vld [vmem:[#allocation8] ss:$8 sps:$4 sm:$0xff]   ;;  %v1197_v22 = vld [vmem:[#allocation8 + $0x14] ss:$8 sps:$4 sm:$0xff]  }
 0x160   :  { %1019 = vmatprep.subr.bf16.mxu0 %v1526_v23  ;;  %1045 = vmatprep.subr.bf16.mxu1 %v1382_v10  ;;  %v1199_v23 = vld [vmem:[#allocation8 + $0x10] ss:$8 sps:$4 sm:$0xff]  }
 0x163   :  { %1021 = vmatpush1.bf16.msra.mxu0 %v1529_v24  ;;  %1047 = vmatpush3.bf16.msra.mxu1 %v1531_v25  ;;  %v1200_v24 = vld [vmem:[#allocation8 + $0x24] ss:$8 sps:$4 sm:$0xff]   ;;  %v1202_v25 = vld [vmem:[#allocation8 + $0x20] ss:$8 sps:$4 sm:$0xff]  }
 0x164   :  { %1023 = vmatprep.subr.bf16.mxu0 %v1533_v26  ;;  %1048 = vmatprep.subr.bf16.mxu1 %v1382_v10  ;;  %v1203_v26 = vld [vmem:[#allocation8 + $0x34] ss:$8 sps:$4 sm:$0xff]  }
 0x167   :  { %1025 = vmatpush1.bf16.msra.mxu0 %v1538_v27  ;;  %1050 = vmatpush3.bf16.msra.mxu1 %v1540_v28  ;;  %v1205_v27 = vld [vmem:[#allocation8 + $0x30] ss:$8 sps:$4 sm:$0xff]   ;;  %v1206_v28 = vld [vmem:[#allocation8 + $0x44] ss:$8 sps:$4 sm:$0xff]  }
 0x168   :  { %1027 = vmatprep.subr.bf16.mxu0 %v1544_v29  ;;  %1051 = vmatprep.subr.bf16.mxu1 %v1382_v10  ;;  %v1208_v29 = vld [vmem:[#allocation8 + $0x40] ss:$8 sps:$4 sm:$0xff]  }
 0x16b   :  { %1029 = vmatpush1.bf16.msra.mxu0 %v1548_v30  ;;  %1053 = vmatpush3.bf16.msra.mxu1 %v1550_v31  ;;  %v1211_v30 = vld [vmem:[#allocation8 + $0x50] ss:$8 sps:$4 sm:$0xff]   ;;  %v1212_v31 = vld [vmem:[#allocation8 + $0x64] ss:$8 sps:$4 sm:$0xff]  }
 0x16c   :  { %1055 = vmatprep.subr.bf16.mxu0 %v1194_v20 }
 0x221   :  { %v425_v62 = vpop.f32.mrb[0].mxu0  ;;  %v496_v63 = vpop.f32.mrb[4].mxu1 }
 0x222   :  { %v426_v1 = vadd.f32 %v425_v62, %v1610_v61  ;;  %v427_v3 = vpop.f32.mrb[1].mxu0  ;;  %v906_v4 = vpop.f32.mrb[5].mxu1  ;;  %v497_v6 = vadd.f32 %v496_v63, %v1615_v2 }
 0x223   :  { %v428_v9 = vadd.f32 %v427_v3, %v351_v8 }
 0x224   :  { %v827_v5 = vmul.f32 -1.442695, %v426_v1  ;;  %v828_v7 = vmul.f32 -1.442695, %v497_v6 }
 0x226   :  { %1230 = vpow2.f32 %v827_v5 }
 0x227   :  { %1232 = vpow2.f32 %v828_v7 }
 0x228   :  { %1234 = vtanh.f32 %v428_v9 }
 0x230   :  { %v1231_v10 = vpop.eup %1230 }
 0x231   :  { %v503_v11 = vadd.f32 1.0, %v1231_v10  ;;  %v1233_v12 = vpop.eup %1232 }
 0x232   :  { %v510_v13 = vadd.f32 1.0, %v1233_v12  ;;  %v1235_v14 = vpop.eup %1234 }
 0x233   :  { %1236 = vrcp.f32 %v503_v11 }
 0x234   :  { %1238 = vrcp.f32 %v510_v13 }
 0x23d   :  { %v1237_v15 = vpop.eup %1236 }
 0x23e   :  { %v513_v16 = vmul.f32 %v1237_v15, %v1235_v14  ;;  %v1239_v17 = vpop.eup %1238 }
 0x240   :  { %1240 = vtanh.f32 %v513_v16 }
 0x24a   :  { %v1241_v18 = vpop.eup %1240 }
 0x24b   :  { %v515_v19 = vmul.f32 %v1241_v18, %v1239_v17 }
 0x24d   :  { %581 = vmatmul.mubr.f32.vlgmr.msra.gmra.mrb[2].mxu0 %v515_v19  ;;  %940 = vmatmul.mubr.f32.vlgmr.msra.gmra.mrb[6].mxu1 %v515_v19 }
 0x24e   :  { %797 = vmatprep.mubr.f32.mxu0 %v1380_v0  ;;  %1057 = vmatpush1.bf16.msra.mxu0 %v1196_v21  ;;  %v1209_v0 = vld [vmem:[#allocation8 + $0x54] ss:$8 sps:$4 sm:$0xff]  }
 0x24f   :  { %1059 = vmatprep.subr.bf16.mxu0 %v1197_v22 }
 0x252   :  { %1061 = vmatpush1.bf16.msra.mxu0 %v1199_v23 }
 0x253   :  { %1063 = vmatprep.subr.bf16.mxu0 %v1200_v24 }
 0x256   :  { %1065 = vmatpush1.bf16.msra.mxu0 %v1202_v25 }
 0x257   :  { %1067 = vmatprep.subr.bf16.mxu0 %v1203_v26 }
 0x25a   :  { %1069 = vmatpush1.bf16.msra.mxu0 %v1205_v27 }
 0x25b   :  { %1071 = vmatprep.subr.bf16.mxu0 %v1206_v28 }
 0x25e   :  { %1073 = vmatpush1.bf16.msra.mxu0 %v1208_v29 }
 0x25f   :  { %1075 = vmatprep.subr.bf16.mxu0 %v1209_v0 }
 0x262   :  { %1077 = vmatpush1.bf16.msra.mxu0 %v1211_v30 }
 0x263   :  { %1079 = vmatprep.subr.bf16.mxu0 %v1212_v31 }
 0x266   :  { %1081 = vmatpush1.bf16.msra.mxu0 %v1214_v32 }
 0x267   :  { %1083 = vmatprep.subr.bf16.mxu0 %v1215_v33 }
 0x26a   :  { %1085 = vmatpush1.bf16.msra.mxu0 %v1217_v35 }
 0x320   :  { %v582_v36 = vpop.f32.mrb[2].mxu0  ;;  %v653_v37 = vpop.f32.mrb[6].mxu1 }
 0x321   :  { %v583_v38 = vadd.f32 %v582_v36, %v1610_v61  ;;  %v584_v39 = vpop.f32.mrb[3].mxu0  ;;  %v941_v40 = vpop.f32.mrb[7].mxu1  ;;  %v654_v42 = vadd.f32 %v653_v37, %v1615_v2 }
 0x322   :  { %v585_v45 = vadd.f32 %v584_v39, %v351_v8 }
 0x323   :  { %v829_v41 = vmul.f32 -1.442695, %v583_v38  ;;  %v830_v43 = vmul.f32 -1.442695, %v654_v42 }
 0x325   :  { %1242 = vpow2.f32 %v829_v41 }
 0x326   :  { %1244 = vpow2.f32 %v830_v43 }
 0x327   :  { %1246 = vtanh.f32 %v585_v45 }
 0x32f   :  { %v1243_v46 = vpop.eup %1242 }
 0x330   :  { %v660_v47 = vadd.f32 1.0, %v1243_v46  ;;  %v1245_v48 = vpop.eup %1244 }
 0x331   :  { %v667_v49 = vadd.f32 1.0, %v1245_v48  ;;  %v1247_v50 = vpop.eup %1246 }
 0x332   :  { %1248 = vrcp.f32 %v660_v47 }
 0x333   :  { %1250 = vrcp.f32 %v667_v49 }
 0x33c   :  { %v1249_v51 = vpop.eup %1248 }
 0x33d   :  { %v670_v52 = vmul.f32 %v1249_v51, %v1247_v50  ;;  %v1251_v53 = vpop.eup %1250 }
 0x33f   :  { %1252 = vtanh.f32 %v670_v52 }
 0x349   :  { %v1253_v54 = vpop.eup %1252 }
 0x34a   :  { %v672_v55 = vmul.f32 %v1253_v54, %v1251_v53 }
 0x34c   :  { %798 = vmatmul.mubr.f32.vlgmr.msra.gmra.mrb[4].mxu0 %v672_v55 }
 0x41f   :  { %v799_v59 = vpop.f32.mrb[4].mxu0 }
 0x420   :  { %v800_v60 = vadd.f32 %v799_v59, %v726_v57  ;;  %v801_v61 = vpop.f32.mrb[5].mxu0 }
 0x421   :  { %v802_v62 = vadd.f32 %v801_v61, %v730_v58 }
 0x422   :  { %804 = vst [vmem:[#allocation10] sm:$0xff] %v800_v60 }
 0x423   :  { %805 = vst [vmem:[#allocation10 + $0x8] sm:$0xff] %v802_v62 }
 0x424   :  { %1353 = shalt.err (!%p1350_p8)
}
 0x425   :  { %s1354_s11 = scalar_lea.hbm %s1646_s7, 256 }
 0x426   :  { %p1355_p9 = scmp.ne.s32.totalorder %s1646_s7, %s1354_s11  ;;  %p1358_p10 = scmp.lt.u32.totalorder %s1354_s11, %s1646_s7 }
 0x428   :  { %p1360_p11 = pnand %p1358_p10, %p1355_p9 }
 0x42a   :  { %1363 = shalt.err (!%p1360_p11)
}
 0x42b   :  { %815 = dma.vmem_to_hbm [thread:$0]  %s813_s8, 256, %s1646_s7, [#allocation4]  }
 0x42c   :  { %1370 = dma.done.wait [#allocation4], 256  }
 0x42d   :  { %1371 = vsyncadd [#allocation4], 4294967040 }
 0x42e   :  { %819 = vsyncpa [#allocation3], 1 }
 0x42f   :  { %820 = vsyncpa [#allocation6], 1 }
 0x430   :  { %821 = vsyncpa [#allocation9], 1 }
 0x431   :  { %822 = vsyncpa [#allocation4], 1 }

</bundles_post_ra>
